<compile_context>
chip_gen: v6e
topology: v6e:2x2x1
jax: 0.10.0
libtpu: 0.0.40
codegen_flags: <defaults>
</compile_context>

<pallas_src>
import jax
import jax.numpy as jnp
from jax.experimental import pallas as pl
from jax.experimental.pallas import tpu as pltpu


_TARGET_TILE_BYTES = 4 * 1024 * 1024   # per-tile budget (see header comment)
_VMEM_LIMIT_BYTES = 40 * 1024 * 1024   # explicit scoped-VMEM limit (all gens)


def _pos_embed_kernel(x_ref, pos_ref, o_ref):
    # Batch dim is squeezed away by the BlockSpec, so both refs are identical
    # 2-D tiles: a single lane-aligned VPU add, no broadcast_in_dim.
    o_ref[...] = x_ref[...] + pos_ref[...]


def _sublane(dtype):
    # Rows packed per vreg: 8 for 4-byte, 16 for 2-byte, 32 for 1-byte dtypes.
    return max(8, 32 // jnp.dtype(dtype).itemsize)


def _choose_tiles(R, C, itemsize, sublane):
    """Pick a (tile_r, tile_c) that is (sublane,128)-legal and ~_TARGET_TILE_BYTES."""
    # Column tile: keep the full lane extent when a sublane-high stripe fits
    # the budget; otherwise take a lane-aligned (multiple-of-128) chunk.
    if C * itemsize * sublane <= _TARGET_TILE_BYTES or C <= 128:
        tile_c = C
    else:
        tile_c = max(128, (_TARGET_TILE_BYTES // (sublane * itemsize)) // 128 * 128)
        tile_c = min(tile_c, C)          # ragged last column tile is masked by Pallas
    rows = max(1, _TARGET_TILE_BYTES // (tile_c * itemsize))
    if R >= sublane:
        tile_r = max(sublane, (min(R, rows) // sublane) * sublane)
    else:
        tile_r = R                       # tiny row extent: full-extent block (legal)
    return tile_r, tile_c


def _maybe_split_rows(tile_r, R, B, tile_c, C, sublane):
    # v7x megacore: if the batch axis alone cannot give both TensorCores work
    # (B == 1) and everything fits one block, split the row axis into 2 blocks.
    if (B == 1 and pl.cdiv(R, tile_r) == 1 and pl.cdiv(C, tile_c) == 1
            and R >= 2 * sublane):
        half = (R + 1) // 2
        tile_r = ((half + sublane - 1) // sublane) * sublane
    return tile_r


def _run(x_view, pos_view, tile_r, tile_c, cost):
    """x_view: (B, R, C); pos_view: (R_pos, C) with enough rows for every block."""
    B, R, C = x_view.shape
    grid = (pl.cdiv(R, tile_r), pl.cdiv(C, tile_c), B)
    return pl.pallas_call(
        _pos_embed_kernel,
        out_shape=jax.ShapeDtypeStruct((B, R, C), x_view.dtype),
        grid_spec=pltpu.PrefetchScalarGridSpec(
            num_scalar_prefetch=0,
            grid=grid,
            in_specs=[
                pl.BlockSpec((pl.Squeezed(), tile_r, tile_c),
                             lambda r, c, b: (b, r, c)),
                # pos tracks the row/column tile axes but not the batch axis:
                # with batch innermost, the same pos tile is reused for every
                # batch element without re-fetching from HBM.
                pl.BlockSpec((tile_r, tile_c), lambda r, c, b: (r, c)),
            ],
            out_specs=pl.BlockSpec((pl.Squeezed(), tile_r, tile_c),
                                   lambda r, c, b: (b, r, c)),
        ),
        compiler_params=pltpu.CompilerParams(
            # No reduction anywhere: lets v7x shard the grid across its two
            # TensorCores; a no-op on single-TC v5e/v6e.
            dimension_semantics=("parallel", "parallel", "parallel"),
            vmem_limit_bytes=_VMEM_LIMIT_BYTES,
        ),
        cost_estimate=cost,
    )(x_view, pos_view)


def positional_embedding(x, pos_embeddings):
    """x: (B, S, D); pos_embeddings: (S_max, D), S <= S_max.

    Equivalent to the PyTorch forward: x + positional_embeddings[:S].unsqueeze(0).
    """
    B, S, D = x.shape
    S_max, D_p = pos_embeddings.shape
    if D != D_p:
        raise ValueError(f"embed_dim mismatch: x has {D}, table has {D_p}")
    if S > S_max:
        raise ValueError(f"sequence length {S} exceeds table length {S_max}")

    # Dtype coercion: the kernel adds and stores in x.dtype (matches PyTorch,
    # where the parameter would be cast by autocast / the caller's dtype).
    pos_embeddings = pos_embeddings.astype(x.dtype)

    itemsize = jnp.dtype(x.dtype).itemsize
    sublane = _sublane(x.dtype)
    cost = pl.CostEstimate(
        flops=B * S * D,
        transcendentals=0,
        bytes_accessed=(2 * B * S * D + S * D) * itemsize,
    )

    if D % 128 != 0 and (S * D) % 128 == 0:
        # D itself is not lane-dense but the flattened per-sequence slab is:
        # view x as (B, R, L) and pos as (R, L) with L a multiple of 128,
        # preferring an L that leaves R >= sublane rows so every vreg is a
        # dense (sublane, 128) tile and every store is an unmasked vst.
        total = S * D
        cap = min(total, 2048)
        cands = [l for l in range(128, cap + 1, 128) if total % l == 0]
        good = [l for l in cands if total // l >= sublane]
        L = max(good) if good else min(cands)
        R = total // L
        x_view = x.reshape(B, R, L)
        pos_view = pos_embeddings[:S, :].reshape(R, L)
        tile_r, tile_c = _choose_tiles(R, L, itemsize, sublane)
        tile_r = _maybe_split_rows(tile_r, R, B, tile_c, L, sublane)
        out = _run(x_view, pos_view, tile_r, tile_c, cost)
        return out.reshape(B, S, D)

    # Generic 3-D path: keep D as the lane axis (tiling it in 128-multiples if
    # it is very large) and tile the sequence axis with a sublane-aligned row
    # count sized to the VMEM budget. If D % 128 != 0 here we accept masked
    # stores — rare fallback.
    tile_r, tile_c = _choose_tiles(S, D, itemsize, sublane)
    tile_r = _maybe_split_rows(tile_r, S, B, tile_c, D, sublane)
    if tile_r % sublane == 0:
        # Sublane-aligned row tile: index the full (S_max, D) embedding table
        # directly via the BlockSpec — no wrapper-side slice/copy in HBM.
        # NOTE: a ragged last row tile may read table rows >= S (always block-
        # index-in-bounds since r*tile_r < S <= S_max); those values only feed
        # output rows that Pallas masks off on store, so they never escape.
        pos_view = pos_embeddings
    else:
        pos_view = pos_embeddings[:S, :]   # full-extent block must match exactly
    return _run(x, pos_view, tile_r, tile_c, cost)


if __name__ == "__main__":
    key = jax.random.PRNGKey(0)
    kx, kp, kx2, kp2, kx3, kp3, kx4, kp4 = jax.random.split(key, 8)

    # --- Test 1: module-sized case (lane-dense via flattening, S*D = 256) ---
    batch, seq_len, embed_dim = 2, 8, 32
    max_sequence_length = 8  # module's sequence_length

    x = jax.random.normal(kx, (batch, seq_len, embed_dim), dtype=jnp.float32)
    pos_embeddings = jax.random.normal(
        kp, (max_sequence_length, embed_dim), dtype=jnp.float32
    )
    out = jax.block_until_ready(positional_embedding(x, pos_embeddings))
    ref = x + pos_embeddings[:seq_len, :][None, :, :]
    assert out.shape == (batch, seq_len, embed_dim)
    assert jnp.allclose(out, ref, atol=1e-6), "mismatch vs reference (test 1)"

    # --- Test 2: lane-dense D, S < S_max (generic 3-D path, full-table pos) ---
    b2, s2, d2, smax2 = 2, 16, 128, 24
    x2 = jax.random.normal(kx2, (b2, s2, d2), dtype=jnp.float32)
    p2 = jax.random.normal(kp2, (smax2, d2), dtype=jnp.float32)
    out2 = jax.block_until_ready(positional_embedding(x2, p2))
    ref2 = x2 + p2[:s2, :][None, :, :]
    assert jnp.allclose(out2, ref2, atol=1e-6), "mismatch vs reference (test 2)"

    # --- Test 3: small D, S < S_max (flattened path with a real pos slice) ---
    b3, s3, d3, smax3 = 3, 8, 32, 16
    x3 = jax.random.normal(kx3, (b3, s3, d3), dtype=jnp.float32)
    p3 = jax.random.normal(kp3, (smax3, d3), dtype=jnp.float32)
    out3 = jax.block_until_ready(positional_embedding(x3, p3))
    ref3 = x3 + p3[:s3, :][None, :, :]
    assert jnp.allclose(out3, ref3, atol=1e-6), "mismatch vs reference (test 3)"

    # --- Test 4: bf16 x with f32 table (dtype coercion + 16-row sublane path) ---
    b4, s4, d4, smax4 = 2, 16, 128, 24
    x4 = jax.random.normal(kx4, (b4, s4, d4), dtype=jnp.bfloat16)
    p4 = jax.random.normal(kp4, (smax4, d4), dtype=jnp.float32)
    out4 = jax.block_until_ready(positional_embedding(x4, p4))
    ref4 = x4 + p4[:s4, :].astype(jnp.bfloat16)[None, :, :]
    assert out4.dtype == jnp.bfloat16
    assert jnp.allclose(out4.astype(jnp.float32), ref4.astype(jnp.float32),
                        atol=1e-2), "mismatch vs reference (test 4)"

    print("KERNEL_OK")
</pallas_src>

<mosaic_0001>
module attributes {stable_mosaic.version = 11 : i64} {
  func.func @_pos_embed_kernel(%arg0: i32, %arg1: i32, %arg2: i32, %arg3: memref<1x2x128xf32, #tpu.memory_space<vmem>>, %arg4: memref<2x128xf32, #tpu.memory_space<vmem>>, %arg5: memref<1x2x128xf32, #tpu.memory_space<vmem>>) attributes {dimension_semantics = [#tpu.dimension_semantics<parallel>, #tpu.dimension_semantics<parallel>, #tpu.dimension_semantics<parallel>], iteration_bounds = array<i64: 1, 1, 2>, scalar_prefetch = 0 : i64, scratch_operands = 0 : i64, tpu.core_type = #tpu.core_type<tc>, window_params = [{transform_indices = @transform_0, window_bounds = array<i64: 1, 2, 128>}, {transform_indices = @transform_1, window_bounds = array<i64: 2, 128>}, {transform_indices = @transform_2, window_bounds = array<i64: 1, 2, 128>}]} {
    %c0 = arith.constant 0 : index
    %c0_0 = arith.constant 0 : index
    %c0_1 = arith.constant 0 : index
    %0 = vector.load %arg3[%c0, %c0_0, %c0_1] : memref<1x2x128xf32, #tpu.memory_space<vmem>>, vector<1x2x128xf32>
    %1 = vector.shape_cast %0 : vector<1x2x128xf32> to vector<2x128xf32>
    %c0_2 = arith.constant 0 : index
    %c0_3 = arith.constant 0 : index
    %2 = vector.load %arg4[%c0_2, %c0_3] : memref<2x128xf32, #tpu.memory_space<vmem>>, vector<2x128xf32>
    %3 = arith.addf %1, %2 : vector<2x128xf32>
    %c0_4 = arith.constant 0 : index
    %c0_5 = arith.constant 0 : index
    %c0_6 = arith.constant 0 : index
    %4 = vector.load %arg5[%c0_4, %c0_5, %c0_6] : memref<1x2x128xf32, #tpu.memory_space<vmem>>, vector<1x2x128xf32>
    %5 = vector.shape_cast %4 : vector<1x2x128xf32> to vector<2x128xf32>
    %6 = vector.shape_cast %3 : vector<2x128xf32> to vector<1x2x128xf32>
    tpu.vector_store %arg5[%c0_4, %c0_5, %c0_6], %6 {strides = array<i32>} : memref<1x2x128xf32, #tpu.memory_space<vmem>>, vector<1x2x128xf32>,
    return
  }
  func.func @transform_0(%arg0: i32, %arg1: i32, %arg2: i32) -> (i32, i32, i32) {
    %c0_i32 = arith.constant 0 : i32
    return %arg2, %arg0, %arg1 : i32, i32, i32
  }
  func.func @transform_1(%arg0: i32, %arg1: i32, %arg2: i32) -> (i32, i32) {
    %c0_i32 = arith.constant 0 : i32
    return %arg0, %arg1 : i32, i32
  }
  func.func @transform_2(%arg0: i32, %arg1: i32, %arg2: i32) -> (i32, i32, i32) {
    %c0_i32 = arith.constant 0 : i32
    return %arg2, %arg0, %arg1 : i32, i32, i32
  }
}

</mosaic_0001>

<bundles_post_ra>
// kernel: tpu_custom_call.1
= control target key start
LH: loop header
LB: loop body
LE: loop exit
PB: predicated region body
PF: predicated region fallthrough
CT: control target
= control target key end

     0   :  { %7 = vsyncpa [#allocation3], 0  ;;  %s736_s0 = inlined_call_operand.hbm [shape: f32[2,2,128], index: 0, kind: input, shape index: {}]   ;;  %s737_s1 = inlined_call_operand.hbm [shape: f32[2,128], index: 1, kind: input, shape index: {}]   ;;  %s738_s2 = inlined_call_operand.hbm [shape: f32[2,2,128], index: 2, kind: output, shape index: {}]  }
   0x1   :  { %9 = vsyncpa [#allocation3 + $0x1], 0 }
   0x2   :  { %10 = vsyncpa [#allocation6], 0 }
   0x3   :  { %11 = vsyncpa [#allocation4], 0 }
   0x4   :  { %13 = vsyncpa [#allocation4 + $0x1], 0  ;;  %s575_s9 = smov 0   ;;  %s577_s10 = smov 0  }
   0x5   :  { %s579_s11 = smov 0   ;;  %s581_s12 = smov 0  }
   0x6   :  { %s583_s13 = smov 0   ;;  %s585_s14 = smov 0  }
   0x7 LB: > { %s329_s15 = sadd.s32 4294967295, %s555_s14   ;;  %s330_s16 = sadd.s32 4294967294, %s555_s14   ;;  %s555_s14 = sphi %s585_s14, %s19_s14   ;;  %s551_s13 = sphi %s583_s13, %s755_s13   ;;  %s547_s12 = sphi %s581_s12, %s754_s12   ;;  %s543_s11 = sphi %s579_s11, %s753_s11   ;;  %s539_s10 = sphi %s577_s10, %s752_s10   ;;  %s535_s9 = sphi %s575_s9, %s751_s9  }
   0x8   : > { %p62_p0 = scmp.ne.s32.totalorder %s539_s10, %s535_s9  ;;  %p609_p1 = scmp.eq.s32.totalorder %s329_s15, 0 }
   0x9   : > { %p613_p2 = scmp.eq.s32.totalorder %s329_s15, 1  ;;  %p124_p3 = scmp.eq.s32.totalorder %s330_s16, 1 }
   0xa   : > { %p619_p4 = por %p609_p1, %p62_p0  ;;  %p331_p5 = scmp.ge.s32.totalorder %s555_s14, 1 }
   0xb   : > { %p624_p6 = por %p124_p3, %p62_p0  ;;  %p131_p7 = scmp.lt.s32.totalorder %s555_s14, 3 }
   0xc   : > { %s742_s19 = scalar_select %p619_p4, 1, 0 }
   0xd   : > { %s743_s20 = scalar_select %p624_p6, 1, 0 }
   0xe   : > { %p629_p8 = pnand %p331_p5, %p131_p7  ;;  %s557_s22 = smov [#allocation5]  }
   0xf   : > { %s147_s23 = sshll.u32 %s557_s22, 4  ;;  %s31_s25 = sadd.s32 1, %s551_s13  ;;  %s148_s23 = int_to_ptr.vmem [resolvable:$true] %s147_s23 }
  0x10   : > { %p352_p10 = pneg %p629_p8  ;;  %s49_s26 = sadd.s32 1, %s543_s11 }
  0x11   : > { %p32_p12 = scmp.ge.s32.totalorder %s31_s25, 2  ;;  %s428_s27 = scalar_lea.vmem %s148_s23, 32 }
  0x12   : > { %p638_p11 = pnand %p352_p10, %p609_p1  ;;  %p429_p0 = scmp.ne.s32.totalorder %s148_s23, %s428_s27 }
  0x13   : > { %p436_p7 = scmp.lt.s32.totalorder %s148_s23, %s148_s23  ;;  %p437_p6 = scmp.lt.s32.totalorder %s428_s27, %s428_s27 }
  0x14   : > { %p419_p13 = pneg %p638_p11 }
  0x15   : > { %p438_p9 = por %p437_p6, %p436_p7 }
  0x16   : > { %p431_p3 = pnand %p429_p0, %p419_p13 }
  0x18   : > { %p432_p5 = pneg %p431_p3 }
  0x1a   : > { %p439_p4 = pnand %p438_p9, %p432_p5 }
  0x1c   : > { %442 = shalt.err (!%p439_p4)
}
  0x1d   : > { %355 = dma.hbm_to_vmem [thread:$0]  (!%p638_p11), %s737_s1, 32, %s148_s23, [#allocation6]  }
  0x1e   : > { %s757_s25 = smov (%p32_p12, %s31_s25), 0  ;;  %p56_p6 = scmp.ne.s32.totalorder %s543_s11, %s539_s10 }
  0x1f   : > { %p57_p4 = scmp.eq.s32.totalorder %s555_s14, 0  ;;  %s42_s30 = ssub.s32 %s551_s13, %s757_s25 }
  0x20   : > { %p365_p9 = scmp.lt.s32.totalorder %s555_s14, 2  ;;  %p47_p10 = scmp.eq.s32.totalorder %s42_s30, 0 }
  0x21   : > { %p58_p13 = por %p57_p4, %p56_p6  ;;  %p661_p0 = por %p613_p2, %p56_p6 }
  0x22   : > { %s158_s4 = sand.u32 1, %s543_s11   ;;  %s335_s7 = sshll.u32 %s551_s13, 5 }
  0x23   : > { %s667_s5 = scalar_select %p47_p10, %s543_s11, %s49_s26  }
  0x24   : > { %s334_s6 = sshll.u32 %s158_s4, 1  ;;  %s169_s16 = scalar_lea.hbm %s736_s0, %s335_s7 }
  0x25   : > { %s162_s22 = scalar_lea.vmem [#allocation2], %s334_s6  ;;  %p673_p11 = pnand %p365_p9, %p58_p13 }
  0x26   : > { %s171_s23 = sshll.u32 %s162_s22, 4  ;;  %s159_s18 = scalar_lea.sflag [#allocation3], %s158_s4  ;;  %s172_s23 = int_to_ptr.vmem [resolvable:$true] %s171_s23 }
  0x27   : > { %p445_p2 = pneg %p673_p11  ;;  %s456_s27 = scalar_lea.vmem %s172_s23, 32 }
  0x28   : > { %p457_p12 = scmp.ne.s32.totalorder %s172_s23, %s456_s27  ;;  %s558_s26 = smov [#allocation2]  }
  0x29   : > { %s461_s28 = sshll.u32 %s558_s26, 4  ;;  %s462_s28 = int_to_ptr.vmem [resolvable:$false] %s461_s28 }
  0x2a   : > { %p459_p3 = pnand %p457_p12, %p445_p2  ;;  %s463_s29 = scalar_lea.vmem %s462_s28, 64 }
  0x2b   : > { %p464_p7 = scmp.lt.s32.totalorder %s172_s23, %s462_s28  ;;  %p465_p6 = scmp.lt.s32.totalorder %s463_s29, %s456_s27 }
  0x2c   : > { %p460_p5 = pneg %p459_p3 }
  0x2d   : > { %p466_p4 = por %p465_p6, %p464_p7 }
  0x2f   : > { %p467_p10 = pnand %p466_p4, %p460_p5 }
  0x31   : > { %470 = shalt.err (!%p467_p10)
}
  0x32   : > { %359 = dma.hbm_to_vmem [thread:$0]  (!%p673_p11), %s169_s16, 32, %s172_s23, %s159_s18  }
  0x33   : > { %180 = sbr.rel (%p629_p8) target bundleno = 83 (0x53), region = 28  ;;  %s684_s30 = sand.u32 (!%p629_p8), 1, %s539_s10  }
  0x34   : > { %s337_s4 = sshll.u32 (!%p629_p8), %s684_s30, 1  ;;  %s183_s6 = scalar_lea.sflag (!%p629_p8), [#allocation3], %s684_s30 }
  0x35   : > { %s186_s7 = scalar_lea.vmem (!%p629_p8), [#allocation2], %s337_s4  ;;  %p748_p9 = scmp.ne.s32.totalorder (!%p629_p8), %s742_s19, 0 }
  0x38   : > { %522 = dma.done.wait (%p748_p9), %s183_s6, 32  }
  0x39   : > { %524 = vsyncadd (%p748_p9), %s183_s6, 4294967264 }
  0x3a   : > { %526 = dma.done.wait (%p609_p1), [#allocation6], 32  }
  0x3b   : > { %528 = vsyncadd (%p609_p1), [#allocation6], 4294967264  ;;  %s210_s21 = scalar_lea.vmem [#allocation7], %s337_s4  ;;  %s341_s15 = sshll.u32 %s547_s12, 5  ;;  %v211_v0 = vld [vmem:[%s186_s7] sm:$0x3] }
  0x3c   : > { %s231_s8 = sshll.u32 %s210_s21, 4  ;;  %v212_v1 = vld [vmem:[#allocation5] sm:$0x3]  ;;  %s229_s19 = scalar_lea.hbm %s738_s2, %s341_s15  ;;  %s232_s8 = int_to_ptr.vmem [resolvable:$true] %s231_s8 }
  0x3d   : > { %v213_v2 = vadd.f32 %v212_v1, %v211_v0  ;;  %s216_s23 = scalar_lea.sflag [#allocation4], %s684_s30  ;;  %s471_s24 = scalar_lea.vmem %s232_s8, 32 }
  0x3e   : > { %p472_p8 = scmp.ne.s32.totalorder %s232_s8, %s471_s24  ;;  %s559_s17 = smov [#allocation7]  }
  0x3f   : > { %214 = vst [vmem:[%s210_s21] sm:$0x3] %v213_v2  ;;  %s475_s18 = sshll.u32 %s559_s17, 4  ;;  %s476_s18 = int_to_ptr.vmem [resolvable:$false] %s475_s18 }
  0x40   : > { %p473_p1 = pnand %p472_p8, %p661_p0  ;;  %s477_s27 = scalar_lea.vmem %s476_s18, 64 }
  0x41   : > { %p478_p11 = scmp.lt.s32.totalorder %s232_s8, %s476_s18  ;;  %p479_p2 = scmp.lt.s32.totalorder %s477_s27, %s471_s24 }
  0x42   : > { %p474_p13 = pneg %p473_p1 }
  0x43   : > { %p480_p12 = por %p479_p2, %p478_p11 }
  0x45   : > { %p481_p3 = pnand %p480_p12, %p474_p13 }
  0x47   : > { %484 = shalt.err (!%p481_p3)
}
  0x48   : > { %s485_s12 = scalar_lea.hbm %s229_s19, 32  ;;  %s489_s29 = scalar_lea.hbm %s738_s2, 64 }
  0x49   : > { %p486_p5 = scmp.ne.s32.totalorder %s229_s19, %s485_s12  ;;  %p490_p4 = scmp.lt.s32.totalorder %s229_s19, %s738_s2 }
  0x4a   : > { %p491_p10 = scmp.lt.s32.totalorder %s489_s29, %s485_s12 }
  0x4b   : > { %p487_p7 = pnand %p486_p5, %p661_p0 }
  0x4c   : > { %p492_p9 = por %p491_p10, %p490_p4 }
  0x4d   : > { %p488_p6 = pneg %p487_p7 }
  0x4f   : > { %p493_p8 = pnand %p492_p9, %p488_p6 }
  0x51   : > { %496 = shalt.err (!%p493_p8)
}
  0x52   : > { %350 = dma.vmem_to_hbm [thread:$0]  (%p661_p0), %s232_s8, 32, %s229_s19, %s216_s23  }
  0x53 PF: > { %s243_s6 = sand.u32 1, %s535_s9   ;;  %p749_p1 = scmp.ne.s32.totalorder %s743_s20, 0 }
  0x54   : > { %p750_p13 = scmp.ge.s32.totalorder %s555_s14, 2  ;;  %s244_s7 = scalar_lea.sflag [#allocation4], %s243_s6 }
  0x56   : > { %p361_p11 = pnand %p750_p13, %p749_p1 }
  0x58   : > { %p362_p2 = pneg %p361_p11 }
  0x5a   : > { %530 = dma.done.wait (%p362_p2), %s244_s7, 32  }
  0x5b   : > { %532 = vsyncadd (%p362_p2), %s244_s7, 4294967264  ;;  %s19_s14 = sadd.s32 1, %s555_s14   ;;  %s751_s9 = smov %s539_s10 }
  0x5c   : > { %p16_p12 = scmp.ge.s32.totalorder %s19_s14, 4   ;;  %s752_s10 = smov %s543_s11 }
  0x5d   : > { %s753_s11 = smov %s667_s5  ;;  %s754_s12 = smov %s551_s13 }
  0x5e   : > { %s755_s13 = smov %s757_s25  ;;  %18 = sbr.rel (!%p16_p12) target bundleno = 7 (0x7), region = 78 }
  0x63   :  { %249 = vsyncpa [#allocation3], 1 }
  0x64   :  { %251 = vsyncpa [#allocation3 + $0x1], 1 }
  0x65   :  { %252 = vsyncpa [#allocation6], 1 }
  0x66   :  { %253 = vsyncpa [#allocation4], 1 }
  0x67   :  { %255 = vsyncpa [#allocation4 + $0x1], 1 }

</bundles_post_ra>
